<compile_context>
chip_gen: v6e
topology: v6e:2x2x1
jax: 0.10.0
libtpu: 0.0.40
codegen_flags: <defaults>
</compile_context>

<pallas_src>
import functools

import jax
import jax.numpy as jnp
from jax.experimental import pallas as pl
from jax.experimental.pallas import tpu as pltpu

EPS = 1e-5


def _round_up(v, m):
    return (v + m - 1) // m * m


def _basic_block_kernel(N, H, W, x_ref, mask_ref, w1_ref, g1_ref, b1_ref,
                        w2_ref, g2_ref, b2_ref, out_ref, rows_ref, mid_ref):
    # x_ref    : (C, Lx)       bf16  zero-padded input, flat (n, row, col) lanes
    # mask_ref : (1, L0)       f32   1.0 on valid flat output positions
    # w*_ref   : (3, Cout, 3C) bf16  [dx][co, dy*C+ci] conv weights
    # g*/b*    : (Cout, 1)     f32   BN gamma / beta
    # out_ref  : (Cout, L0)    f32   flat conv-grid output (wrapper slices)
    # rows_ref : (3C, Lr)      bf16  dy row-shift staging (shared by both convs)
    # mid_ref  : (Cout, Lx)    bf16  zero-padded intermediate
    C = x_ref.shape[0]
    Cout = out_ref.shape[0]          # == C (downsample=None)
    Hp, Wp = H + 2, W + 2
    HpWp = Hp * Wp
    L0 = N * HpWp
    Lx = x_ref.shape[1]
    Ls = L0 + 2                      # staged row length (covers dx shifts 0..2)
    lo = Wp + 1                      # interior offset inside a padded slab
    inv_count = 1.0 / float(N * H * W)

    mask = mask_ref[...]                                    # (1, L0)

    def conv3x3(src_ref, w_ref):
        # Stage only the three dy row-shifts (3 copies, bf16), then three
        # accumulating K=3C matmuls at lane offsets dx in {0,1,2}.
        for dy in range(3):
            rows_ref[dy * C:(dy + 1) * C, :Ls] = src_ref[:, dy * Wp:dy * Wp + Ls]
        acc = jnp.dot(w_ref[0], rows_ref[:, 0:L0],
                      preferred_element_type=jnp.float32)
        acc += jnp.dot(w_ref[1], rows_ref[:, 1:1 + L0],
                       preferred_element_type=jnp.float32)
        acc += jnp.dot(w_ref[2], rows_ref[:, 2:2 + L0],
                       preferred_element_type=jnp.float32)
        return acc                                          # (Cout, L0) f32

    def batchnorm(y, g_ref, b_ref):
        # Training-mode BN, single fused masked sum / sum-of-squares pass,
        # folded into a per-channel FMA (y*a + c).
        ym = y * mask
        s = jnp.sum(ym, axis=1, keepdims=True)              # (Cout, 1)
        ss = jnp.sum(ym * y, axis=1, keepdims=True)
        mean = s * inv_count
        var = ss * inv_count - mean * mean                  # biased variance
        a = g_ref[...] * jax.lax.rsqrt(var + EPS)
        c = b_ref[...] - mean * a
        return y * a + c

    # conv1 -> bn1 -> relu; mask fused into the store so pad / garbage columns
    # feed conv2 as zeros.  Only the borders of the padded intermediate get an
    # explicit zero fill.
    h1 = jnp.maximum(batchnorm(conv3x3(x_ref, w1_ref), g1_ref, b1_ref), 0.0)
    mid_ref[:, 0:lo] = jnp.zeros((Cout, lo), mid_ref.dtype)
    mid_ref[:, lo:lo + L0] = (h1 * mask).astype(mid_ref.dtype)
    tail = Lx - (lo + L0)
    if tail > 0:
        mid_ref[:, lo + L0:Lx] = jnp.zeros((Cout, tail), mid_ref.dtype)

    # conv2 -> bn2 -> + residual -> relu.  Residual is read back from the
    # padded-input slab interior, not from a second HBM input.
    h2 = batchnorm(conv3x3(mid_ref, w2_ref), g2_ref, b2_ref)
    res = x_ref[:, lo:lo + L0].astype(jnp.float32)
    out_ref[...] = jnp.maximum(h2 + res, 0.0).astype(out_ref.dtype)


def _prep_weight(w, C):
    # OIHW (Cout, Cin, 3, 3) -> (dx, Cout, dy*Cin) bf16, matching the
    # dy-stacked staging rows and the three dx-shifted matmuls.
    Cout = w.shape[0]
    return jnp.transpose(w, (3, 0, 2, 1)).reshape(3, Cout, 3 * C).astype(jnp.bfloat16)


def basic_block(x_nchw, w1, g1, b1, w2, g2, b2):
    """x_nchw: (N, C, H, W) f32; w*: (Cout, Cin, 3, 3) OIHW; g*, b*: (Cout,)."""
    N, C, H, W = x_nchw.shape
    Cout = w1.shape[0]
    assert Cout == C, "downsample=None requires inplanes == planes"
    Hp, Wp = H + 2, W + 2
    HpWp = Hp * Wp
    L0 = N * HpWp
    Lx = _round_up(L0 + 2 * Wp + 2, 128)     # room for the largest tap shift
    Lr = _round_up(L0 + 2, 128)              # staging buffer lane extent

    # Zero-padded, channel-first, flat, bf16 activation (single HBM stream;
    # padding done once in the wrapper instead of N*H sub-vreg stores).
    xp = jnp.pad(x_nchw, ((0, 0), (0, 0), (1, 1), (1, 1)))          # (N,C,Hp,Wp)
    x_cf = jnp.transpose(xp, (1, 0, 2, 3)).reshape(C, L0)
    x_cf = jnp.pad(x_cf, ((0, 0), (0, Lx - L0))).astype(jnp.bfloat16)

    w1m = _prep_weight(w1, C)
    w2m = _prep_weight(w2, Cout)

    # Validity mask over the flat padded conv grid (tiny: 4*L0 bytes).
    rr = jnp.arange(Hp)[:, None]
    cc = jnp.arange(Wp)[None, :]
    m = ((rr < H) & (cc < W)).astype(jnp.float32)                   # (Hp, Wp)
    mask = jnp.tile(m[None], (N, 1, 1)).reshape(1, L0)

    vmem = pl.BlockSpec(memory_space=pltpu.MemorySpace.VMEM)
    kern = functools.partial(_basic_block_kernel, N, H, W)
    out_flat = pl.pallas_call(
        kern,
        out_shape=jax.ShapeDtypeStruct((Cout, L0), jnp.float32),
        in_specs=[vmem] * 8,
        out_specs=vmem,
        scratch_shapes=[pltpu.VMEM((3 * C, Lr), jnp.bfloat16),      # dy row-shift staging
                        pltpu.VMEM((Cout, Lx), jnp.bfloat16)],      # padded intermediate
        # Headroom for larger monolithic shapes; actual usage here is < 100 KiB.
        compiler_params=pltpu.CompilerParams(vmem_limit_bytes=32 * 1024 * 1024),
    )(x_cf, mask, w1m,
      g1.reshape(Cout, 1).astype(jnp.float32),
      b1.reshape(Cout, 1).astype(jnp.float32),
      w2m,
      g2.reshape(Cout, 1).astype(jnp.float32),
      b2.reshape(Cout, 1).astype(jnp.float32))

    # Drop the pad / garbage columns and go back to NCHW.
    out = out_flat.reshape(Cout, N, Hp, Wp)[:, :, :H, :W]
    return jnp.transpose(out, (1, 0, 2, 3))


def basic_block_reference(x, w1, g1, b1, w2, g2, b2):
    """Pure-JAX NCHW reference matching PyTorch training-mode BasicBlock."""
    def conv(x, w):
        return jax.lax.conv_general_dilated(
            x, w, window_strides=(1, 1), padding=((1, 1), (1, 1)),
            dimension_numbers=("NCHW", "OIHW", "NCHW"))

    def bn(y, g, b):
        mean = jnp.mean(y, axis=(0, 2, 3), keepdims=True)
        var = jnp.mean((y - mean) ** 2, axis=(0, 2, 3), keepdims=True)
        return ((y - mean) * jax.lax.rsqrt(var + EPS)
                * g.reshape(1, -1, 1, 1) + b.reshape(1, -1, 1, 1))

    h = jax.nn.relu(bn(conv(x, w1), g1, b1))
    h = bn(conv(h, w2), g2, b2)
    return jax.nn.relu(h + x)


if __name__ == "__main__":
    key = jax.random.PRNGKey(0)
    N, C, H, W = 2, 4, 16, 16          # inplanes = planes = 4, stride = 1
    k0, k1, k2, k3, k4, k5, k6 = jax.random.split(key, 7)

    x = jax.random.normal(k0, (N, C, H, W), jnp.float32)
    w1 = jax.random.normal(k1, (C, C, 3, 3), jnp.float32) * 0.1
    w2 = jax.random.normal(k2, (C, C, 3, 3), jnp.float32) * 0.1
    g1 = 1.0 + 0.1 * jax.random.normal(k3, (C,), jnp.float32)
    b1 = 0.1 * jax.random.normal(k4, (C,), jnp.float32)
    g2 = 1.0 + 0.1 * jax.random.normal(k5, (C,), jnp.float32)
    b2 = 0.1 * jax.random.normal(k6, (C,), jnp.float32)

    out = basic_block(x, w1, g1, b1, w2, g2, b2)
    out = jax.block_until_ready(out)

    ref = basic_block_reference(x, w1, g1, b1, w2, g2, b2)
    assert out.shape == (N, C, H, W)
    # Note: activations (incl. the residual) are bf16-quantized at the kernel
    # boundary and convs use bf16 operands with f32 accumulation, hence the
    # loose tolerance vs the all-f32 PyTorch reference.
    assert jnp.allclose(out, ref, atol=2e-2, rtol=2e-2), \
        f"max abs err {jnp.max(jnp.abs(out - ref))}"

    print("KERNEL_OK")
</pallas_src>

<mosaic_0001>
module attributes {stable_mosaic.version = 11 : i64} {
  func.func @_basic_block_kernel(%arg0: memref<4x768xbf16, #tpu.memory_space<vmem>>, %arg1: memref<1x648xf32, #tpu.memory_space<vmem>>, %arg2: memref<3x4x12xbf16, #tpu.memory_space<vmem>>, %arg3: memref<4x1xf32, #tpu.memory_space<vmem>>, %arg4: memref<4x1xf32, #tpu.memory_space<vmem>>, %arg5: memref<3x4x12xbf16, #tpu.memory_space<vmem>>, %arg6: memref<4x1xf32, #tpu.memory_space<vmem>>, %arg7: memref<4x1xf32, #tpu.memory_space<vmem>>, %arg8: memref<4x648xf32, #tpu.memory_space<vmem>>, %arg9: memref<12x768xbf16, #tpu.memory_space<vmem>>, %arg10: memref<4x768xbf16, #tpu.memory_space<vmem>>) attributes {dimension_semantics = [], scalar_prefetch = 0 : i64, scratch_operands = 2 : i64, tpu.core_type = #tpu.core_type<tc>} {
    %c0 = arith.constant 0 : index
    %c0_0 = arith.constant 0 : index
    %0 = vector.load %arg1[%c0, %c0_0] : memref<1x648xf32, #tpu.memory_space<vmem>>, vector<1x648xf32>
    %c0_1 = arith.constant 0 : index
    %c0_2 = arith.constant 0 : index
    %1 = vector.load %arg0[%c0_1, %c0_2] : memref<4x768xbf16, #tpu.memory_space<vmem>>, vector<4x650xbf16>
    %c0_3 = arith.constant 0 : index
    %c0_4 = arith.constant 0 : index
    %2 = vector.load %arg9[%c0_3, %c0_4] : memref<12x768xbf16, #tpu.memory_space<vmem>>, vector<4x650xbf16>
    tpu.vector_store %arg9[%c0_3, %c0_4], %1 {strides = array<i32>} : memref<12x768xbf16, #tpu.memory_space<vmem>>, vector<4x650xbf16>,
    %c0_5 = arith.constant 0 : index
    %c18 = arith.constant 18 : index
    %3 = vector.load %arg0[%c0_5, %c18] : memref<4x768xbf16, #tpu.memory_space<vmem>>, vector<4x650xbf16>
    %c4 = arith.constant 4 : index
    %c0_6 = arith.constant 0 : index
    %4 = vector.load %arg9[%c4, %c0_6] : memref<12x768xbf16, #tpu.memory_space<vmem>>, vector<4x650xbf16>
    tpu.vector_store %arg9[%c4, %c0_6], %3 {strides = array<i32>} : memref<12x768xbf16, #tpu.memory_space<vmem>>, vector<4x650xbf16>,
    %c0_7 = arith.constant 0 : index
    %c36 = arith.constant 36 : index
    %5 = vector.load %arg0[%c0_7, %c36] : memref<4x768xbf16, #tpu.memory_space<vmem>>, vector<4x650xbf16>
    %c8 = arith.constant 8 : index
    %c0_8 = arith.constant 0 : index
    %6 = vector.load %arg9[%c8, %c0_8] : memref<12x768xbf16, #tpu.memory_space<vmem>>, vector<4x650xbf16>
    tpu.vector_store %arg9[%c8, %c0_8], %5 {strides = array<i32>} : memref<12x768xbf16, #tpu.memory_space<vmem>>, vector<4x650xbf16>,
    %c0_9 = arith.constant 0 : index
    %c0_10 = arith.constant 0 : index
    %c0_11 = arith.constant 0 : index
    %7 = vector.load %arg2[%c0_9, %c0_10, %c0_11] : memref<3x4x12xbf16, #tpu.memory_space<vmem>>, vector<1x4x12xbf16>
    %8 = vector.shape_cast %7 : vector<1x4x12xbf16> to vector<4x12xbf16>
    %c0_12 = arith.constant 0 : index
    %c0_13 = arith.constant 0 : index
    %9 = vector.load %arg9[%c0_12, %c0_13] : memref<12x768xbf16, #tpu.memory_space<vmem>>, vector<12x648xbf16>
    %cst = arith.constant dense<0.000000e+00> : vector<4x648xf32>
    %10 = tpu.matmul %8, %9, %cst {dimension_numbers = #tpu.dot_dimension_numbers<[1], [0], [0], [1], [0, 0, 1, 1], [], []>} : vector<4x12xbf16>, vector<12x648xbf16>, vector<4x648xf32> -> vector<4x648xf32>
    %c1 = arith.constant 1 : index
    %c0_14 = arith.constant 0 : index
    %c0_15 = arith.constant 0 : index
    %11 = vector.load %arg2[%c1, %c0_14, %c0_15] : memref<3x4x12xbf16, #tpu.memory_space<vmem>>, vector<1x4x12xbf16>
    %12 = vector.shape_cast %11 : vector<1x4x12xbf16> to vector<4x12xbf16>
    %c0_16 = arith.constant 0 : index
    %c1_17 = arith.constant 1 : index
    %13 = vector.load %arg9[%c0_16, %c1_17] : memref<12x768xbf16, #tpu.memory_space<vmem>>, vector<12x648xbf16>
    %cst_18 = arith.constant dense<0.000000e+00> : vector<4x648xf32>
    %14 = tpu.matmul %12, %13, %cst_18 {dimension_numbers = #tpu.dot_dimension_numbers<[1], [0], [0], [1], [0, 0, 1, 1], [], []>} : vector<4x12xbf16>, vector<12x648xbf16>, vector<4x648xf32> -> vector<4x648xf32>
    %15 = arith.addf %10, %14 : vector<4x648xf32>
    %c2 = arith.constant 2 : index
    %c0_19 = arith.constant 0 : index
    %c0_20 = arith.constant 0 : index
    %16 = vector.load %arg2[%c2, %c0_19, %c0_20] : memref<3x4x12xbf16, #tpu.memory_space<vmem>>, vector<1x4x12xbf16>
    %17 = vector.shape_cast %16 : vector<1x4x12xbf16> to vector<4x12xbf16>
    %c0_21 = arith.constant 0 : index
    %c2_22 = arith.constant 2 : index
    %18 = vector.load %arg9[%c0_21, %c2_22] : memref<12x768xbf16, #tpu.memory_space<vmem>>, vector<12x648xbf16>
    %cst_23 = arith.constant dense<0.000000e+00> : vector<4x648xf32>
    %19 = tpu.matmul %17, %18, %cst_23 {dimension_numbers = #tpu.dot_dimension_numbers<[1], [0], [0], [1], [0, 0, 1, 1], [], []>} : vector<4x12xbf16>, vector<12x648xbf16>, vector<4x648xf32> -> vector<4x648xf32>
    %20 = arith.addf %15, %19 : vector<4x648xf32>
    %21 = vector.broadcast %0 : vector<1x648xf32> to vector<4x648xf32>
    %22 = arith.mulf %20, %21 : vector<4x648xf32>
    %cst_24 = arith.constant dense<0.000000e+00> : vector<4xf32>
    %23 = vector.multi_reduction <add>, %22, %cst_24 [1] : vector<4x648xf32> to vector<4xf32>
    %24 = vector.shape_cast %23 : vector<4xf32> to vector<4x1xf32>
    %25 = arith.mulf %22, %20 : vector<4x648xf32>
    %cst_25 = arith.constant dense<0.000000e+00> : vector<4xf32>
    %26 = vector.multi_reduction <add>, %25, %cst_25 [1] : vector<4x648xf32> to vector<4xf32>
    %27 = vector.shape_cast %26 : vector<4xf32> to vector<4x1xf32>
    %cst_26 = arith.constant 0.001953125 : f32
    %28 = vector.broadcast %cst_26 : f32 to vector<4x1xf32>
    %29 = arith.mulf %24, %28 : vector<4x1xf32>
    %cst_27 = arith.constant 0.001953125 : f32
    %30 = vector.broadcast %cst_27 : f32 to vector<4x1xf32>
    %31 = arith.mulf %27, %30 : vector<4x1xf32>
    %32 = arith.mulf %29, %29 : vector<4x1xf32>
    %33 = arith.subf %31, %32 : vector<4x1xf32>
    %c0_28 = arith.constant 0 : index
    %c0_29 = arith.constant 0 : index
    %34 = vector.load %arg3[%c0_28, %c0_29] : memref<4x1xf32, #tpu.memory_space<vmem>>, vector<4x1xf32>
    %cst_30 = arith.constant 9.99999974E-6 : f32
    %35 = vector.broadcast %cst_30 : f32 to vector<4x1xf32>
    %36 = arith.addf %33, %35 : vector<4x1xf32>
    %37 = math.rsqrt %36 : vector<4x1xf32>
    %38 = arith.mulf %34, %37 : vector<4x1xf32>
    %c0_31 = arith.constant 0 : index
    %c0_32 = arith.constant 0 : index
    %39 = vector.load %arg4[%c0_31, %c0_32] : memref<4x1xf32, #tpu.memory_space<vmem>>, vector<4x1xf32>
    %40 = arith.mulf %29, %38 : vector<4x1xf32>
    %41 = arith.subf %39, %40 : vector<4x1xf32>
    %42 = vector.broadcast %38 : vector<4x1xf32> to vector<4x648xf32>
    %43 = arith.mulf %20, %42 : vector<4x648xf32>
    %44 = vector.broadcast %41 : vector<4x1xf32> to vector<4x648xf32>
    %45 = arith.addf %43, %44 : vector<4x648xf32>
    %cst_33 = arith.constant 0.000000e+00 : f32
    %46 = vector.broadcast %cst_33 : f32 to vector<4x648xf32>
    %47 = arith.maximumf %45, %46 : vector<4x648xf32>
    %cst_34 = arith.constant 0.000000e+00 : bf16
    %48 = vector.broadcast %cst_34 : bf16 to vector<4x19xbf16>
    %c0_35 = arith.constant 0 : index
    %c0_36 = arith.constant 0 : index
    %49 = vector.load %arg10[%c0_35, %c0_36] : memref<4x768xbf16, #tpu.memory_space<vmem>>, vector<4x19xbf16>
    tpu.vector_store %arg10[%c0_35, %c0_36], %48 {strides = array<i32>} : memref<4x768xbf16, #tpu.memory_space<vmem>>, vector<4x19xbf16>,
    %50 = vector.broadcast %0 : vector<1x648xf32> to vector<4x648xf32>
    %51 = arith.mulf %47, %50 : vector<4x648xf32>
    %52 = arith.truncf %51 : vector<4x648xf32> to vector<4x648xbf16>
    %c0_37 = arith.constant 0 : index
    %c19 = arith.constant 19 : index
    %53 = vector.load %arg10[%c0_37, %c19] : memref<4x768xbf16, #tpu.memory_space<vmem>>, vector<4x648xbf16>
    tpu.vector_store %arg10[%c0_37, %c19], %52 {strides = array<i32>} : memref<4x768xbf16, #tpu.memory_space<vmem>>, vector<4x648xbf16>,
    %cst_38 = arith.constant 0.000000e+00 : bf16
    %54 = vector.broadcast %cst_38 : bf16 to vector<4x101xbf16>
    %c0_39 = arith.constant 0 : index
    %c667 = arith.constant 667 : index
    %55 = vector.load %arg10[%c0_39, %c667] : memref<4x768xbf16, #tpu.memory_space<vmem>>, vector<4x101xbf16>
    tpu.vector_store %arg10[%c0_39, %c667], %54 {strides = array<i32>} : memref<4x768xbf16, #tpu.memory_space<vmem>>, vector<4x101xbf16>,
    %c0_40 = arith.constant 0 : index
    %c0_41 = arith.constant 0 : index
    %56 = vector.load %arg10[%c0_40, %c0_41] : memref<4x768xbf16, #tpu.memory_space<vmem>>, vector<4x650xbf16>
    %c0_42 = arith.constant 0 : index
    %c0_43 = arith.constant 0 : index
    %57 = vector.load %arg9[%c0_42, %c0_43] : memref<12x768xbf16, #tpu.memory_space<vmem>>, vector<4x650xbf16>
    tpu.vector_store %arg9[%c0_42, %c0_43], %56 {strides = array<i32>} : memref<12x768xbf16, #tpu.memory_space<vmem>>, vector<4x650xbf16>,
    %c0_44 = arith.constant 0 : index
    %c18_45 = arith.constant 18 : index
    %58 = vector.load %arg10[%c0_44, %c18_45] : memref<4x768xbf16, #tpu.memory_space<vmem>>, vector<4x650xbf16>
    %c4_46 = arith.constant 4 : index
    %c0_47 = arith.constant 0 : index
    %59 = vector.load %arg9[%c4_46, %c0_47] : memref<12x768xbf16, #tpu.memory_space<vmem>>, vector<4x650xbf16>
    tpu.vector_store %arg9[%c4_46, %c0_47], %58 {strides = array<i32>} : memref<12x768xbf16, #tpu.memory_space<vmem>>, vector<4x650xbf16>,
    %c0_48 = arith.constant 0 : index
    %c36_49 = arith.constant 36 : index
    %60 = vector.load %arg10[%c0_48, %c36_49] : memref<4x768xbf16, #tpu.memory_space<vmem>>, vector<4x650xbf16>
    %c8_50 = arith.constant 8 : index
    %c0_51 = arith.constant 0 : index
    %61 = vector.load %arg9[%c8_50, %c0_51] : memref<12x768xbf16, #tpu.memory_space<vmem>>, vector<4x650xbf16>
    tpu.vector_store %arg9[%c8_50, %c0_51], %60 {strides = array<i32>} : memref<12x768xbf16, #tpu.memory_space<vmem>>, vector<4x650xbf16>,
    %c0_52 = arith.constant 0 : index
    %c0_53 = arith.constant 0 : index
    %c0_54 = arith.constant 0 : index
    %62 = vector.load %arg5[%c0_52, %c0_53, %c0_54] : memref<3x4x12xbf16, #tpu.memory_space<vmem>>, vector<1x4x12xbf16>
    %63 = vector.shape_cast %62 : vector<1x4x12xbf16> to vector<4x12xbf16>
    %c0_55 = arith.constant 0 : index
    %c0_56 = arith.constant 0 : index
    %64 = vector.load %arg9[%c0_55, %c0_56] : memref<12x768xbf16, #tpu.memory_space<vmem>>, vector<12x648xbf16>
    %cst_57 = arith.constant dense<0.000000e+00> : vector<4x648xf32>
    %65 = tpu.matmul %63, %64, %cst_57 {dimension_numbers = #tpu.dot_dimension_numbers<[1], [0], [0], [1], [0, 0, 1, 1], [], []>} : vector<4x12xbf16>, vector<12x648xbf16>, vector<4x648xf32> -> vector<4x648xf32>
    %c1_58 = arith.constant 1 : index
    %c0_59 = arith.constant 0 : index
    %c0_60 = arith.constant 0 : index
    %66 = vector.load %arg5[%c1_58, %c0_59, %c0_60] : memref<3x4x12xbf16, #tpu.memory_space<vmem>>, vector<1x4x12xbf16>
    %67 = vector.shape_cast %66 : vector<1x4x12xbf16> to vector<4x12xbf16>
    %c0_61 = arith.constant 0 : index
    %c1_62 = arith.constant 1 : index
    %68 = vector.load %arg9[%c0_61, %c1_62] : memref<12x768xbf16, #tpu.memory_space<vmem>>, vector<12x648xbf16>
    %cst_63 = arith.constant dense<0.000000e+00> : vector<4x648xf32>
    %69 = tpu.matmul %67, %68, %cst_63 {dimension_numbers = #tpu.dot_dimension_numbers<[1], [0], [0], [1], [0, 0, 1, 1], [], []>} : vector<4x12xbf16>, vector<12x648xbf16>, vector<4x648xf32> -> vector<4x648xf32>
    %70 = arith.addf %65, %69 : vector<4x648xf32>
    %c2_64 = arith.constant 2 : index
    %c0_65 = arith.constant 0 : index
    %c0_66 = arith.constant 0 : index
    %71 = vector.load %arg5[%c2_64, %c0_65, %c0_66] : memref<3x4x12xbf16, #tpu.memory_space<vmem>>, vector<1x4x12xbf16>
    %72 = vector.shape_cast %71 : vector<1x4x12xbf16> to vector<4x12xbf16>
    %c0_67 = arith.constant 0 : index
    %c2_68 = arith.constant 2 : index
    %73 = vector.load %arg9[%c0_67, %c2_68] : memref<12x768xbf16, #tpu.memory_space<vmem>>, vector<12x648xbf16>
    %cst_69 = arith.constant dense<0.000000e+00> : vector<4x648xf32>
    %74 = tpu.matmul %72, %73, %cst_69 {dimension_numbers = #tpu.dot_dimension_numbers<[1], [0], [0], [1], [0, 0, 1, 1], [], []>} : vector<4x12xbf16>, vector<12x648xbf16>, vector<4x648xf32> -> vector<4x648xf32>
    %75 = arith.addf %70, %74 : vector<4x648xf32>
    %76 = vector.broadcast %0 : vector<1x648xf32> to vector<4x648xf32>
    %77 = arith.mulf %75, %76 : vector<4x648xf32>
    %cst_70 = arith.constant dense<0.000000e+00> : vector<4xf32>
    %78 = vector.multi_reduction <add>, %77, %cst_70 [1] : vector<4x648xf32> to vector<4xf32>
    %79 = vector.shape_cast %78 : vector<4xf32> to vector<4x1xf32>
    %80 = arith.mulf %77, %75 : vector<4x648xf32>
    %cst_71 = arith.constant dense<0.000000e+00> : vector<4xf32>
    %81 = vector.multi_reduction <add>, %80, %cst_71 [1] : vector<4x648xf32> to vector<4xf32>
    %82 = vector.shape_cast %81 : vector<4xf32> to vector<4x1xf32>
    %cst_72 = arith.constant 0.001953125 : f32
    %83 = vector.broadcast %cst_72 : f32 to vector<4x1xf32>
    %84 = arith.mulf %79, %83 : vector<4x1xf32>
    %cst_73 = arith.constant 0.001953125 : f32
    %85 = vector.broadcast %cst_73 : f32 to vector<4x1xf32>
    %86 = arith.mulf %82, %85 : vector<4x1xf32>
    %87 = arith.mulf %84, %84 : vector<4x1xf32>
    %88 = arith.subf %86, %87 : vector<4x1xf32>
    %c0_74 = arith.constant 0 : index
    %c0_75 = arith.constant 0 : index
    %89 = vector.load %arg6[%c0_74, %c0_75] : memref<4x1xf32, #tpu.memory_space<vmem>>, vector<4x1xf32>
    %cst_76 = arith.constant 9.99999974E-6 : f32
    %90 = vector.broadcast %cst_76 : f32 to vector<4x1xf32>
    %91 = arith.addf %88, %90 : vector<4x1xf32>
    %92 = math.rsqrt %91 : vector<4x1xf32>
    %93 = arith.mulf %89, %92 : vector<4x1xf32>
    %c0_77 = arith.constant 0 : index
    %c0_78 = arith.constant 0 : index
    %94 = vector.load %arg7[%c0_77, %c0_78] : memref<4x1xf32, #tpu.memory_space<vmem>>, vector<4x1xf32>
    %95 = arith.mulf %84, %93 : vector<4x1xf32>
    %96 = arith.subf %94, %95 : vector<4x1xf32>
    %97 = vector.broadcast %93 : vector<4x1xf32> to vector<4x648xf32>
    %98 = arith.mulf %75, %97 : vector<4x648xf32>
    %99 = vector.broadcast %96 : vector<4x1xf32> to vector<4x648xf32>
    %100 = arith.addf %98, %99 : vector<4x648xf32>
    %c0_79 = arith.constant 0 : index
    %c19_80 = arith.constant 19 : index
    %101 = vector.load %arg0[%c0_79, %c19_80] : memref<4x768xbf16, #tpu.memory_space<vmem>>, vector<4x648xbf16>
    %102 = arith.extf %101 : vector<4x648xbf16> to vector<4x648xf32>
    %103 = arith.addf %100, %102 : vector<4x648xf32>
    %cst_81 = arith.constant 0.000000e+00 : f32
    %104 = vector.broadcast %cst_81 : f32 to vector<4x648xf32>
    %105 = arith.maximumf %103, %104 : vector<4x648xf32>
    %c0_82 = arith.constant 0 : index
    %c0_83 = arith.constant 0 : index
    %106 = vector.load %arg8[%c0_82, %c0_83] : memref<4x648xf32, #tpu.memory_space<vmem>>, vector<4x648xf32>
    tpu.vector_store %arg8[%c0_82, %c0_83], %105 {strides = array<i32>} : memref<4x648xf32, #tpu.memory_space<vmem>>, vector<4x648xf32>,
    return
  }
}

</mosaic_0001>

<bundles_post_ra>
// kernel: tpu_custom_call.1
= control target key start
LH: loop header
LB: loop body
LE: loop exit
PB: predicated region body
PF: predicated region fallthrough
CT: control target
= control target key end

     0   :  { %13 = vsyncpa [#allocation5], 0  ;;  %s2216_s0 = inlined_call_operand.vmem [shape: bf16[4,768], index: 0, kind: input, shape index: {}]   ;;  %s2217_s1 = inlined_call_operand.vmem [shape: f32[1,648], index: 1, kind: input, shape index: {}]   ;;  %s2218_s2 = inlined_call_operand.hbm [shape: bf16[3,4,12], index: 2, kind: input, shape index: {}]   ;;  %s2219_s3 = inlined_call_operand.vmem [shape: f32[4,1], index: 3, kind: input, shape index: {}]   ;;  %s2220_s4 = inlined_call_operand.vmem [shape: f32[4,1], index: 4, kind: input, shape index: {}]   ;;  %s2221_s5 = inlined_call_operand.vmem [shape: bf16[3,4,12], index: 5, kind: input, shape index: {}]   ;;  %s2222_s6 = inlined_call_operand.vmem [shape: f32[4,1], index: 6, kind: input, shape index: {}]   ;;  %s2223_s7 = inlined_call_operand.vmem [shape: f32[4,1], index: 7, kind: input, shape index: {}]   ;;  %s2224_s8 = inlined_call_operand.hbm [shape: f32[4,648], index: 8, kind: output, shape index: {}]  }
   0x1   :  { %14 = vsyncpa [#allocation6], 0  ;;  %s1814_s27 = smov [#allocation4]  }
   0x2   :  { %s24_s28 = sshll.u32 %s1814_s27, 4  ;;  %s25_s28 = int_to_ptr.vmem [resolvable:$true] %s24_s28 }
   0x3   :  { %s1778_s29 = scalar_lea.vmem %s25_s28, 96  ;;  %p1783_p1 = scmp.lt.s32.totalorder %s25_s28, %s25_s28 }
   0x4   :  { %p1779_p0 = scmp.ne.s32.totalorder %s25_s28, %s1778_s29  ;;  %p1784_p2 = scmp.lt.s32.totalorder %s1778_s29, %s1778_s29 }
   0x6   :  { %p1785_p3 = por %p1784_p2, %p1783_p1 }
   0x8   :  { %p1786_p4 = pnand %p1785_p3, %p1779_p0 }
   0xa   :  { %1789 = shalt.err (!%p1786_p4)
}
   0xb   :  { %s1815_s30 = smov 32   ;;  %s1816_s9 = smov 2  }
   0xc   :  { %30 = dma.hbm_to_vmem [thread:$0]  %s2218_s2, 96, %s25_s28, [#allocation5], %s1815_s30, %s1815_s30, %s1816_s9  }
   0xd   :  { %1810 = dma.done.wait [#allocation5], 96  }
   0xe   :  { %1811 = vsyncadd [#allocation5], 4294967200  ;;  %v89_v0 = vlaneseq  ;;  %v1817_v1 = vmov 1983009808   ;;  %vm77_vm0 = vcmask 1041408   ;;  %vm78_vm1 = vcmask 78852  }
   0xf   :  { %v87_v2 = vunpack.c.l.s4 %v1817_v1  ;;  %vm1880_vm2 = vmor %vm78_vm1, %vm77_vm0  ;;  %v133_v7 = vld [vmem:[%s2216_s0] sm:$0xff]  ;;  %v1745_v8 = vld [vmem:[%s2216_s0 + $0x8] ss:$0 sps:$4 sm:$0xff]   ;;  %s1818_s17 = smov 92   ;;  %s1819_s18 = smov 110   ;;  %vm129_vm3 = vcmask 1043458  }
  0x10   :  { %v1874_v3 = vshrl.u32 %v89_v0, 7  ;;  %v137_v10 = vcombine.high %v133_v7, %v133_v7  ;;  %v85_v11 = vcombine.low %v133_v7, %v133_v7  ;;  %v1656_v12 = vld.sshfl [vmem:[%s2216_s0 + $0x8] sm:$0x33 pattern:$0x76325410]  ;;  %vm130_vm4 = vcmask 80902  }
  0x11   :  { %v88_v4 = vunpack.c.0.s8 %v87_v2  ;;  %1654 = vst.sshfl [vmem:[#allocation2] sm:$0xf pattern:$0x76325410] %v133_v7  ;;  %80 = vst.msk [vmem:[#allocation2 + $0x10] sm:$0x33] %vm1880_vm2, %v1656_v12 }
  0x12   :  { %1655 = vst.sshfl [vmem:[#allocation2 + $0x8] sm:$0xf pattern:$0x76325410] %v137_v10  ;;  %vm117_vm5 = vcmask 1043456   ;;  %vm2230_vm6 = vcmask 900096   ;;  %vm1906_vm7 = vmor %vm130_vm4, %vm129_vm3 }
  0x13   :  { %v1877_v5 = vsub.s32 %v88_v4, %v1874_v3  ;;  %vm169_vm8 = vcmask 752640   ;;  %v1820_v40 = vmov 0   ;;  %s1821_s19 = smov 127   ;;  %s1822_s20 = smov 126   ;;  %vm2229_vm9 = vcmask 1039360  }
  0x14   :  { %286 = vmatprep.mubr.bf16.mxu0 %v1820_v40  ;;  %327 = vmatprep.mubr.bf16.mxu1 %v1820_v40  ;;  %vm2228_vm10 = vcmask 1045504   ;;  %v188_v54 = vld [vmem:[#allocation4 + $0x2] sm:$0x3]  ;;  %vm2227_vm11 = vcmask 97280   ;;  %vm2226_vm12 = vcmask 1031168   ;;  %vm2225_vm13 = vcmask 60416  }
  0x15   :  { %v144_v9 = vrot.slane %v133_v7, %v1877_v5  ;;  %v107_v13 = vrot.slane %v1745_v8, %v1877_v5  ;;  %v92_v14 = vrot.slane %v85_v11, %v1877_v5  ;;  %v151_v15 = vrot.slane %v137_v10, %v1877_v5  ;;  %1726 = vset.pattern.permute.xlu0 %v1820_v40  ;;  %v180_v4 = vld [vmem:[#allocation4] sm:$0x3] }
  0x16   :  { %1727 = vset.pattern.permute.xlu1 %v1820_v40  ;;  %vm801_vm14 = vcmask 148480   ;;  %vm859_vm15 = vcmask 1041560   ;;  %vm861_vm4 = vcmask 1045508  }
  0x17   :  { %159 = vrot.lane.b32.xlu1 %v144_v9, %s1818_s17  ;;  %110 = vrot.lane.b32.xlu0 %v144_v9, %s1819_s18  ;;  %802 = vst.msk [vmem:[#allocation3] sm:$0x3] %vm801_vm14, %v1820_v40  ;;  %vm860_vm1 = vmor %vm129_vm3, %vm859_vm15 }
  0x18   :  { %vm862_vm14 = vmor %vm861_vm4, %vm860_vm1  ;;  %vm2248_vm4 = vcmask 97280  }
  0x1b   :  { %112 = vrot.lane.b32.xlu1 %v107_v13, %s1819_s18  ;;  %108 = vrot.lane.b32.xlu0 %v92_v14, %s1819_s18 }
  0x1f   :  { %163 = vrot.lane.b32.xlu1 %v1656_v12, %s1818_s17  ;;  %161 = vrot.lane.b32.xlu0 %v151_v15, %s1818_s17 }
  0x89   :  { %v160_v16 = vpop.permute.xlu1 %159  ;;  %v111_v17 = vpop.permute.xlu0 %110 }
  0x8a   :  { %v115_v20 = vrot.slane %v111_v17, 4  ;;  %v165_v31 = vrot.slane %v160_v16, 4 }
  0x8d   :  { %v113_v18 = vpop.permute.xlu1 %112  ;;  %v109_v19 = vpop.permute.xlu0 %108 }
  0x8e   :  { %v116_v22 = vrot.slane %v113_v18, 4  ;;  %v114_v23 = vrot.slane %v109_v19, 4 }
  0x90   :  { %v121_v24 = vsel %vm117_vm5, %v115_v20, %v116_v22  ;;  %v123_v25 = vsel %vm2230_vm6, %v113_v18, %v116_v22  ;;  %v118_v26 = vsel %vm117_vm5, %v114_v23, %v115_v20 }
  0x91   :  { %v122_v27 = vsel %vm2230_vm6, %v111_v17, %v121_v24  ;;  %132 = vst.msk [vmem:[#allocation2 + $0x10] sm:$0xcc] %vm1906_vm7, %v123_v25  ;;  %v120_v28 = vsel %vm2230_vm6, %v109_v19, %v118_v26  ;;  %v164_v29 = vpop.permute.xlu1 %163  ;;  %v162_v30 = vpop.permute.xlu0 %161  ;;  %v522_v17 = vld [vmem:[#allocation4 + $0x4] sm:$0x3]  ;;  %vm869_vm6 = vcmask 1041624  }
  0x92   :  { %128 = vst [vmem:[#allocation2 + $0x8] sm:$0xcc] %v122_v27  ;;  %127 = vst [vmem:[#allocation2] sm:$0xcc] %v120_v28  ;;  %v167_v32 = vrot.slane %v164_v29, 4  ;;  %v166_v33 = vrot.slane %v162_v30, 4 }
  0x94   :  { %v173_v34 = vsel %vm169_vm8, %v164_v29, %v167_v32  ;;  %v168_v35 = vsel %vm117_vm5, %v165_v31, %v166_v33  ;;  %v171_v36 = vsel %vm117_vm5, %v166_v33, %v167_v32 }
  0x95   :  { %179 = vst.msk [vmem:[#allocation2 + $0x28] sm:$0x33] %vm1880_vm2, %v173_v34  ;;  %v170_v37 = vsel %vm169_vm8, %v160_v16, %v168_v35  ;;  %v172_v38 = vsel %vm169_vm8, %v162_v30, %v171_v36 }
  0x96   :  { %177 = vst [vmem:[#allocation2 + $0x18] sm:$0x33] %v170_v37  ;;  %178 = vst [vmem:[#allocation2 + $0x20] sm:$0x33] %v172_v38  ;;  %v694_v38 = vsub.s32 0, %v1874_v3 }
  0x9c   :  { %v1752_v44 = vld [vmem:[#allocation2 + $0x14] ss:$24 sps:$4 sm:$0x3f]   ;;  %v1754_v45 = vld [vmem:[#allocation2 + $0x10] ss:$24 sps:$4 sm:$0x3f]  }
  0x9d   :  { %v1746_v39 = vld [vmem:[#allocation2 + $0x4] ss:$24 sps:$4 sm:$0x3f]   ;;  %v1748_v41 = vld [vmem:[#allocation2] ss:$24 sps:$4 sm:$0x3f]  }
  0x9e   :  { %215 = vrot.lane.b32.xlu1 %v1746_v39, %s1821_s19  ;;  %213 = vrot.lane.b32.xlu0 %v1748_v41, %s1821_s19  ;;  %v1749_v42 = vld [vmem:[#allocation2 + $0xc] ss:$24 sps:$4 sm:$0x3f]   ;;  %v1751_v43 = vld [vmem:[#allocation2 + $0x8] ss:$24 sps:$4 sm:$0x3f]  }
  0x9f   :  { %v381_v63 = vsel %vm2228_vm10, %v1748_v41, 0  ;;  %v387_v2 = vsel %vm2228_vm10, %v1751_v43, 0  ;;  %v393_v10 = vsel %vm2228_vm10, %v1754_v45, 0 }
  0xa2   :  { %219 = vrot.lane.b32.xlu1 %v1749_v42, %s1821_s19  ;;  %217 = vrot.lane.b32.xlu0 %v1751_v43, %s1821_s19 }
  0xa6   :  { %223 = vrot.lane.b32.xlu1 %v1752_v44, %s1821_s19  ;;  %221 = vrot.lane.b32.xlu0 %v1754_v45, %s1821_s19 }
  0xaa   :  { %525 = vrot.lane.b32.xlu1 %v1746_v39, %s1822_s20  ;;  %523 = vrot.lane.b32.xlu0 %v1748_v41, %s1822_s20 }
  0xae   :  { %529 = vrot.lane.b32.xlu1 %v1749_v42, %s1822_s20  ;;  %527 = vrot.lane.b32.xlu0 %v1751_v43, %s1822_s20  ;;  %v698_v43 = vsub.s32 1, %v1874_v3 }
  0xb2   :  { %533 = vrot.lane.b32.xlu1 %v1752_v44, %s1822_s20  ;;  %531 = vrot.lane.b32.xlu0 %v1754_v45, %s1822_s20 }
 0x110   :  { %v216_v46 = vpop.permute.xlu1 %215  ;;  %v214_v47 = vpop.permute.xlu0 %213 }
 0x111   :  { %v226_v49 = vsel %vm2229_vm9, %v214_v47, %v216_v46 }
 0x112   :  { %v237_v52 = vsel %vm2228_vm10, %v226_v49, 0 }
 0x114   :  { %v220_v48 = vpop.permute.xlu1 %219  ;;  %v218_v50 = vpop.permute.xlu0 %217 }
 0x115   :  { %v227_v51 = vsel %vm2229_vm9, %v216_v46, %v218_v50  ;;  %v228_v55 = vsel %vm2229_vm9, %v218_v50, %v220_v48 }
 0x116   :  { %1663 = vmatprep.subr.msk.bf16.mxu0 %vm2228_vm10, %v227_v51  ;;  %v243_v60 = vsel %vm2228_vm10, %v228_v55, 0 }
 0x117   :  { %269 = vmatpush1.bf16.msra.mxu0 %v237_v52 }
 0x118   :  { %v224_v53 = vpop.permute.xlu1 %223  ;;  %v222_v56 = vpop.permute.xlu0 %221 }
 0x119   :  { %1667 = vmatprep.subr.msk.bf16.mxu0 %vm2228_vm10, %v224_v53  ;;  %v230_v57 = vsel %vm2229_vm9, %v222_v56, %v224_v53  ;;  %v229_v58 = vsel %vm2229_vm9, %v220_v48, %v222_v56  ;;  %v702_v48 = vsub.s32 2, %v1874_v3 }
 0x11a   :  { %v249_v59 = vsel %vm2228_vm10, %v230_v57, 0  ;;  %1664 = vmatmul.mubr.msk.bf16.vlgmr.msra.gmra.mxu0 %vm2227_vm11, %v188_v54  ;;  %1665 = vmatprep.subr.msk.bf16.mxu1 %vm2228_vm10, %v229_v58  ;;  %v710_v57 = vsub.s32 4, %v1874_v3  ;;  %v714_v58 = vsub.s32 5, %v1874_v3 }
 0x11b   :  { %310 = vmatpush1.bf16.msra.mxu1 %v243_v60  ;;  %351 = vmatpush1.bf16.msra.mxu0 %v249_v59 }
 0x11c   :  { %1669 = vmatprep.subr.msk.bf16.mxu1 %vm2228_vm10, %v1746_v39  ;;  %1671 = vmatprep.subr.msk.bf16.mxu0 %vm2228_vm10, %v1749_v42  ;;  %v524_v61 = vpop.permute.xlu0 %523  ;;  %v526_v62 = vpop.permute.xlu1 %525  ;;  %v45_v42 = vld [vmem:[%s2217_s1] sm:$0x3f] }
 0x11d   :  { %368 = vmatprep.mubr.bf16.mxu0 %v1820_v40  ;;  %v536_v11 = vsel %vm2226_vm12, %v524_v61, %v526_v62  ;;  %v1991_v47 = vrot.slane %v45_v42, %v694_v38  ;;  %v1996_v53 = vrot.slane %v45_v42, %v698_v43 }
 0x11e   :  { %1666 = vmatmul.mubr.msk.bf16.vlgmr.msra.gmra.mxu1 %vm2227_vm11, %v188_v54  ;;  %v545_v12 = vsel %vm2228_vm10, %v536_v11, 0  ;;  %v2014_v11 = vrot.slane %v45_v42, %v710_v57 }
 0x11f   :  { %413 = vmatpush1.bf16.msra.mxu1 %v381_v63  ;;  %430 = vmatprep.mubr.bf16.mxu1 %v1820_v40 }
 0x120   :  { %1673 = vmatprep.subr.msk.bf16.mxu1 %vm2228_vm10, %v1752_v44  ;;  %v528_v0 = vpop.permute.xlu0 %527  ;;  %v530_v7 = vpop.permute.xlu1 %529 }
 0x121   :  { %v537_v1 = vsel %vm2226_vm12, %v526_v62, %v528_v0  ;;  %v538_v13 = vsel %vm2226_vm12, %v528_v0, %v530_v7  ;;  %v2005_v62 = vrot.slane %v45_v42, %v702_v48 }
 0x122   :  { %1668 = vmatmul.mubr.msk.bf16.vlgmr.msra.gmra.mxu0 %vm2227_vm11, %v188_v54  ;;  %v551_v15 = vsel %vm2228_vm10, %v538_v13, 0  ;;  %v706_v54 = vsub.s32 3, %v1874_v3 }
 0x123   :  { %454 = vmatpush1.bf16.msra.mxu0 %v387_v2  ;;  %471 = vmatprep.mubr.bf16.mxu0 %v1820_v40 }
 0x124   :  { %1675 = vmatprep.subr.msk.bf16.mxu0 %vm2228_vm10, %v537_v1  ;;  %v532_v8 = vpop.permute.xlu0 %531  ;;  %v534_v14 = vpop.permute.xlu1 %533 }
 0x125   :  { %v539_v9 = vsel %vm2226_vm12, %v530_v7, %v532_v8  ;;  %v540_v16 = vsel %vm2226_vm12, %v532_v8, %v534_v14  ;;  %v2012_v7 = vrot.slane %v45_v42, %v706_v54  ;;  %vm852_vm12 = vcmask 154624  }
 0x126   :  { %1670 = vmatmul.mubr.msk.bf16.vlgmr.msra.gmra.mxu1 %vm2227_vm11, %v180_v4  ;;  %v557_v18 = vsel %vm2228_vm10, %v540_v16, 0 }
 0x127   :  { %495 = vmatpush1.bf16.msra.mxu1 %v393_v10  ;;  %512 = vmatprep.mubr.bf16.mxu1 %v1820_v40 }
 0x128   :  { %1677 = vmatprep.subr.msk.bf16.mxu1 %vm2228_vm10, %v539_v9 }
 0x12a   :  { %1672 = vmatmul.mubr.msk.bf16.vlgmr.msra.gmra.mxu0 %vm2227_vm11, %v180_v4 }
 0x12b   :  { %577 = vmatpush1.bf16.msra.mxu0 %v545_v12  ;;  %594 = vmatprep.mubr.bf16.mxu0 %v1820_v40  ;;  %v2016_v12 = vrot.slane %v45_v42, %v714_v58 }
 0x12c   :  { %1679 = vmatprep.subr.msk.bf16.mxu0 %vm2228_vm10, %v534_v14  ;;  %vm866_vm10 = vcmask 216066  }
 0x12d   :  { %vm867_vm9 = vmor %vm866_vm10, %vm77_vm0 }
 0x12e   :  { %1674 = vmatmul.mubr.msk.bf16.vlgmr.msra.gmra.mxu1 %vm2227_vm11, %v180_v4 }
 0x12f   :  { %618 = vmatpush1.bf16.msra.mxu1 %v551_v15  ;;  %635 = vmatprep.mubr.bf16.mxu1 %v1820_v40 }
 0x132   :  { %1676 = vmatmul.mubr.msk.bf16.vlgmr.msra.gmra.mxu0 %vm2227_vm11, %v522_v17 }
 0x133   :  { %659 = vmatpush1.bf16.msra.mxu0 %v557_v18  ;;  %676 = vmatprep.mubr.bf16.mxu0 %v1820_v40 }
 0x136   :  { %1678 = vmatmul.mubr.msk.bf16.vlgmr.msra.gmra.mxu1 %vm2227_vm11, %v522_v17 }
 0x137   :  { %1099 = vmatprep.mubr.bf16.mxu1 %v1820_v40 }
 0x13a   :  { %1680 = vmatmul.mubr.msk.bf16.vlgmr.msra.gmra.mxu0 %vm2227_vm11, %v522_v17 }
 0x13b   :  { %1140 = vmatprep.mubr.bf16.mxu0 %v1820_v40 }
 0x1da   :  { %v288_v19 = vpop.f32.mrf.mxu0 }
 0x1dc   :  { %v290_v20 = vpop.f32.mrf.mxu0 }
 0x1de   :  { %v292_v22 = vpop.f32.mrf.mxu0  ;;  %v329_v23 = vpop.f32.mrf.mxu1 }
 0x1e0   :  { %v293_v24 = vpop.f32.mrf.mxu0  ;;  %v331_v25 = vpop.f32.mrf.mxu1 }
 0x1e2   :  { %v333_v26 = vpop.f32.mrf.mxu1  ;;  %v370_v27 = vpop.f32.mrf.mxu0 }
 0x1e4   :  { %v334_v28 = vpop.f32.mrf.mxu1  ;;  %v372_v29 = vpop.f32.mrf.mxu0 }
 0x1e6   :  { %v374_v30 = vpop.f32.mrf.mxu0  ;;  %v432_v31 = vpop.f32.mrf.mxu1 }
 0x1e7   :  { %v433_v46 = vadd.f32 %v432_v31, %v288_v19 }
 0x1e8   :  { %v375_v32 = vpop.f32.mrf.mxu0  ;;  %v434_v33 = vpop.f32.mrf.mxu1 }
 0x1e9   :  { %v435_v51 = vadd.f32 %v434_v33, %v290_v20 }
 0x1ea   :  { %v436_v34 = vpop.f32.mrf.mxu1  ;;  %v473_v35 = vpop.f32.mrf.mxu0 }
 0x1eb   :  { %v474_v59 = vadd.f32 %v473_v35, %v329_v23 }
 0x1ec   :  { %v437_v36 = vpop.f32.mrf.mxu1  ;;  %v475_v37 = vpop.f32.mrf.mxu0 }
 0x1ed   :  { %v476_v3 = vadd.f32 %v475_v37, %v331_v25 }
 0x1ee   :  { %v477_v39 = vpop.f32.mrf.mxu0  ;;  %v514_v41 = vpop.f32.mrf.mxu1 }
 0x1ef   :  { %v515_v8 = vadd.f32 %v514_v41, %v370_v27 }
 0x1f0   :  { %v478_v44 = vpop.f32.mrf.mxu0  ;;  %v516_v45 = vpop.f32.mrf.mxu1 }
 0x1f1   :  { %v517_v17 = vadd.f32 %v516_v45, %v372_v29 }
 0x1f2   :  { %v518_v49 = vpop.f32.mrf.mxu1  ;;  %v596_v50 = vpop.f32.mrf.mxu0 }
 0x1f3   :  { %v1994_v52 = vadd.f32 %v596_v50, %v433_v46 }
 0x1f4   :  { %v519_v55 = vpop.f32.mrf.mxu1  ;;  %v598_v56 = vpop.f32.mrf.mxu0 }
 0x1f5   :  { %v722_v60 = vmul.f32 %v1991_v47, %v1994_v52  ;;  %v2003_v61 = vadd.f32 %v598_v56, %v435_v51 }
 0x1f6   :  { %v600_v63 = vpop.f32.mrf.mxu0  ;;  %v637_v0 = vpop.f32.mrf.mxu1 }
 0x1f7   :  { %v743_v1 = vmul.f32 %v722_v60, %v1994_v52  ;;  %v723_v2 = vmul.f32 %v1996_v53, %v2003_v61  ;;  %v2010_v4 = vadd.f32 %v637_v0, %v474_v59  ;;  %v729_v13 = vsel %vm117_vm5, %v722_v60, 0.0 }
 0x1f8   :  { %v601_v9 = vpop.f32.mrf.mxu0  ;;  %v639_v10 = vpop.f32.mrf.mxu1 }
 0x1f9   :  { %v730_v14 = vsel %vm117_vm5, %v723_v2, 0.0  ;;  %v744_v15 = vmul.f32 %v723_v2, %v2003_v61  ;;  %v724_v16 = vmul.f32 %v2005_v62, %v2010_v4  ;;  %v749_v18 = vsel %vm117_vm5, %v743_v1, 0.0 }
 0x1fa   :  { %v731_v19 = vadd.f32 %v730_v14, %v729_v13  ;;  %v688_v20 = vadd.f32 %v639_v10, %v476_v3  ;;  %v641_v22 = vpop.f32.mrf.mxu1  ;;  %v678_v23 = vpop.f32.mrf.mxu0  ;;  %v770_v13 = vld [vmem:[%s2220_s4] sm:$0xf] }
 0x1fb   :  { %v750_v24 = vsel %vm117_vm5, %v744_v15, 0.0  ;;  %v732_v25 = vsel %vm117_vm5, %v724_v16, 0.0  ;;  %v745_v26 = vmul.f32 %v724_v16, %v2010_v4  ;;  %v689_v27 = vadd.f32 %v678_v23, %v515_v8  ;;  %v766_v8 = vld [vmem:[%s2219_s3] sm:$0xf]  ;;  %s1823_s3 = smov 19  }
 0x1fc   :  { %v751_v28 = vadd.f32 %v750_v24, %v749_v18  ;;  %v725_v30 = vmul.f32 %v2012_v7, %v688_v20  ;;  %v642_v31 = vpop.f32.mrf.mxu1  ;;  %v680_v32 = vpop.f32.mrf.mxu0  ;;  %v733_v33 = vadd.f32 %v732_v25, %v731_v19 }
 0x1fd   :  { %v752_v29 = vsel %vm117_vm5, %v745_v26, 0.0  ;;  %v726_v34 = vmul.f32 %v2014_v11, %v689_v27  ;;  %v690_v35 = vadd.f32 %v680_v32, %v517_v17 }
 0x1fe   :  { %v746_v36 = vmul.f32 %v725_v30, %v688_v20  ;;  %v682_v37 = vpop.f32.mrf.mxu0  ;;  %v734_v38 = vsel %vm117_vm5, %v725_v30, 0.0  ;;  %v753_v39 = vadd.f32 %v752_v29, %v751_v28 }
 0x1ff   :  { %v747_v41 = vmul.f32 %v726_v34, %v689_v27  ;;  %v727_v42 = vmul.f32 %v2016_v12, %v690_v35  ;;  %v735_v43 = vadd.f32 %v734_v38, %v733_v33  ;;  %v736_v44 = vsel %vm117_vm5, %v726_v34, 0.0 }
 0x200   :  { %v683_v45 = vpop.f32.mrf.mxu0  ;;  %v754_v46 = vsel %vm117_vm5, %v746_v36, 0.0 }
 0x201   :  { %v737_v48 = vadd.f32 %v736_v44, %v735_v43  ;;  %v739_v49 = vsel %vm2225_vm13, %v727_v42, 0.0  ;;  %v748_v50 = vmul.f32 %v727_v42, %v690_v35  ;;  %v755_v51 = vadd.f32 %v754_v46, %v753_v39 }
 0x202   :  { %v756_v54 = vsel %vm117_vm5, %v747_v41, 0.0 }
 0x203   :  { %v740_v55 = vadd.f32 %v739_v49, %v737_v48  ;;  %v757_v56 = vadd.f32 %v756_v54, %v755_v51  ;;  %v758_v57 = vsel %vm2225_vm13, %v748_v50, 0.0  ;;  %vm863_vm13 = vcmask 1047558  }
 0x204   :  { %vm864_vm11 = vmor %vm863_vm13, %vm862_vm14 }
 0x205   :  { %741 = vadd.xlane.f32.xlu0 %v740_v55  ;;  %v759_v58 = vadd.f32 %v758_v57, %v757_v56 }
 0x207   :  { %760 = vadd.xlane.f32.xlu1 %v759_v58 }
 0x28e   :  { %v742_v59 = vpop.xlane.xlu0 %741 }
 0x28f   :  { %v762_v60 = vmul.f32 0.001953125, %v742_v59 }
 0x290   :  { %v761_v63 = vpop.xlane.xlu1 %760 }
 0x291   :  { %v764_v0 = vmul.f32 %v762_v60, %v762_v60  ;;  %v763_v1 = vmul.f32 0.001953125, %v761_v63 }
 0x293   :  { %v765_v2 = vsub.f32 %v763_v1, %v764_v0 }
 0x295   :  { %v767_v3 = vadd.f32 1e-05, %v765_v2 }
 0x297   :  { %1766 = vrsqrt.f32 %v767_v3 }
 0x2a4   :  { %v1767_v9 = vpop.eup %1766 }
 0x2a5   :  { %v769_v10 = vmul.f32 %v1767_v9, %v766_v8 }
 0x2a7   :  { %775 = vperm.xlu0 %1726, %v769_v10   ;;  %v771_v14 = vmul.f32 %v769_v10, %v762_v60 }
 0x2a9   :  { %v772_v15 = vsub.f32 %v770_v13, %v771_v14 }
 0x2ab   :  { %786 = vperm.xlu1 %1727, %v772_v15  }
 0x322   :  { %v776_v16 = vpop.permute.xlu0 %775 }
 0x323   :  { %v778_v17 = vmul.f32 %v776_v16, %v1994_v52  ;;  %v779_v18 = vmul.f32 %v776_v16, %v2003_v61  ;;  %v780_v19 = vmul.f32 %v776_v16, %v2010_v4  ;;  %v781_v22 = vmul.f32 %v776_v16, %v688_v20 }
 0x324   :  { %v782_v23 = vmul.f32 %v776_v16, %v689_v27  ;;  %v783_v24 = vmul.f32 %v776_v16, %v690_v35 }
 0x326   :  { %v787_v25 = vpop.permute.xlu1 %786 }
 0x327   :  { %v789_v26 = vadd.f32 %v787_v25, %v778_v17  ;;  %v790_v28 = vadd.f32 %v787_v25, %v779_v18  ;;  %v791_v30 = vadd.f32 %v787_v25, %v780_v19  ;;  %v792_v31 = vadd.f32 %v787_v25, %v781_v22 }
 0x328   :  { %v793_v32 = vadd.f32 %v787_v25, %v782_v23  ;;  %v794_v33 = vadd.f32 %v787_v25, %v783_v24 }
 0x329   :  { %v795_v29 = vmax.f32 %v789_v26, 0.0  ;;  %v796_v34 = vmax.f32 %v790_v28, 0.0  ;;  %v797_v36 = vmax.f32 %v791_v30, 0.0  ;;  %v798_v37 = vmax.f32 %v792_v31, 0.0 }
 0x32a   :  { %v799_v38 = vmax.f32 %v793_v32, 0.0  ;;  %v800_v52 = vmax.f32 %v794_v33, 0.0 }
 0x32b   :  { %v803_v61 = vmul.f32 %v795_v29, %v1991_v47  ;;  %v804_v4 = vmul.f32 %v796_v34, %v1996_v53  ;;  %v805_v20 = vmul.f32 %v797_v36, %v2005_v62  ;;  %v806_v27 = vmul.f32 %v798_v37, %v2012_v7 }
 0x32c   :  { %v807_v41 = vmul.f32 %v799_v38, %v2014_v11  ;;  %v808_v42 = vmul.f32 %v800_v52, %v2016_v12 }
 0x32d   :  { %v1681_v35 = vpack.c.bf16 %v804_v4, %v803_v61  ;;  %v1682_v39 = vpack.c.bf16 %v806_v27, %v805_v20 }
 0x32e   :  { %v1683_v46 = vpack.c.bf16 %v808_v42, %v807_v41 }
 0x32f   :  { %v829_v43 = vrot.slane %v1681_v35, %v1877_v5  ;;  %v836_v44 = vrot.slane %v1682_v39, %v1877_v5 }
 0x330   :  { %v845_v48 = vrot.slane %v1683_v46, %v1877_v5 }
 0x331   :  { %v837_v45 = vcombine.low %v829_v43, %v836_v44  ;;  %v1688_v44 = vld [vmem:[%s2221_s5 + $0x2] sm:$0x3] }
 0x333   :  { %846 = vrot.lane.b32.xlu1 %v837_v45, %s1823_s3 }
 0x337   :  { %848 = vrot.lane.b32.xlu1 %v845_v48, %s1823_s3 }
 0x3a5   :  { %v847_v49 = vpop.permute.xlu1 %846 }
 0x3a6   :  { %v850_v50 = vrot.slane %v847_v49, 6 }
 0x3a8   :  { %v853_v51 = vsel %vm852_vm12, %v850_v50, %v847_v49 }
 0x3a9   :  { %865 = vst.msk [vmem:[#allocation3] sm:$0xff] %vm864_vm11, %v853_v51  ;;  %v849_v54 = vpop.permute.xlu1 %848 }
 0x3aa   :  { %v851_v55 = vrot.slane %v849_v54, 6 }
 0x3ac   :  { %v855_v56 = vsel %vm77_vm0, %v850_v50, %v851_v55  ;;  %vm2235_vm0 = vcmask 900096  }
 0x3ad   :  { %v856_v57 = vsel %vm852_vm12, %v855_v56, %v849_v54  ;;  %vm2236_vm3 = vmmov %vm2235_vm0 }
 0x3ae   :  { %868 = vst.msk [vmem:[#allocation3 + $0x8] sm:$0xf] %vm867_vm9, %v856_v57 }
 0x3af   :  { %870 = vst.msk [vmem:[#allocation3 + $0xa] sm:$0x3] %vm869_vm6, %v1820_v40  ;;  %vm2237_vm6 = vmmov %vm2235_vm0 }
 0x3b0   :  { %v871_v58 = vld [vmem:[#allocation3] sm:$0xff] }
 0x3b1   :  { %v875_v59 = vcombine.high %v871_v58, %v871_v58  ;;  %1685 = vst.sshfl [vmem:[#allocation2] sm:$0xf pattern:$0x76325410] %v871_v58  ;;  %v921_v60 = vrot.slane %v871_v58, %v1877_v5  ;;  %v907_v0 = vcombine.low %v871_v58, %v871_v58 }
 0x3b3   :  { %1686 = vst.sshfl [vmem:[#allocation2 + $0x8] sm:$0xf pattern:$0x76325410] %v875_v59  ;;  %932 = vrot.lane.b32.xlu1 %v921_v60, %s1819_s18  ;;  %v968_v63 = vrot.slane %v875_v59, %v1877_v5  ;;  %v914_v2 = vrot.slane %v907_v0, %v1877_v5  ;;  %v996_v59 = vld [vmem:[%s2221_s5] sm:$0x3] }
 0x3b5   :  { %978 = vrot.lane.b32.xlu0 %v968_v63, %s1818_s17  ;;  %v1756_v3 = vld [vmem:[#allocation3 + $0x8] ss:$0 sps:$4 sm:$0xff]  }
 0x3b6   :  { %v1684_v1 = vld.sshfl [vmem:[#allocation3 + $0x8] sm:$0x33 pattern:$0x76325410]  ;;  %v929_v8 = vrot.slane %v1756_v3, %v1877_v5 }
 0x3b7   :  { %902 = vst.msk [vmem:[#allocation2 + $0x10] sm:$0x33] %vm1880_vm2, %v1684_v1  ;;  %976 = vrot.lane.b32.xlu1 %v921_v60, %s1818_s17 }
 0x3bb   :  { %930 = vrot.lane.b32.xlu1 %v914_v2, %s1819_s18 }
 0x3bf   :  { %934 = vrot.lane.b32.xlu1 %v929_v8, %s1819_s18 }
 0x3c3   :  { %980 = vrot.lane.b32.xlu1 %v1684_v1, %s1818_s17 }
 0x425   :  { %v933_v9 = vpop.permute.xlu1 %932 }
 0x426   :  { %v937_v19 = vrot.slane %v933_v9, 4 }
 0x427   :  { %v979_v10 = vpop.permute.xlu0 %978 }
 0x428   :  { %v983_v14 = vrot.slane %v979_v10, 4 }
 0x429   :  { %v977_v13 = vpop.permute.xlu1 %976 }
 0x42a   :  { %v982_v15 = vrot.slane %v977_v13, 4 }
 0x42c   :  { %v985_v16 = vsel %vm117_vm5, %v982_v15, %v983_v14 }
 0x42d   :  { %v986_v17 = vsel %vm169_vm8, %v977_v13, %v985_v16  ;;  %v931_v18 = vpop.permute.xlu1 %930 }
 0x42e   :  { %993 = vst [vmem:[#allocation2 + $0x18] sm:$0x33] %v986_v17  ;;  %v936_v22 = vrot.slane %v931_v18, 4 }
 0x430   :  { %v939_v23 = vsel %vm117_vm5, %v936_v22, %v937_v19 }
 0x431   :  { %v940_v5 = vsel %vm2235_vm0, %v931_v18, %v939_v23  ;;  %v935_v24 = vpop.permute.xlu1 %934 }
 0x432   :  { %947 = vst [vmem:[#allocation2] sm:$0xcc] %v940_v5  ;;  %v938_v25 = vrot.slane %v935_v24, 4 }
 0x434   :  { %v941_v26 = vsel %vm117_vm5, %v937_v19, %v938_v25  ;;  %v943_v28 = vsel %vm2236_vm3, %v935_v24, %v938_v25 }
 0x435   :  { %v942_v30 = vsel %vm2237_vm6, %v933_v9, %v941_v26  ;;  %949 = vst.msk [vmem:[#allocation2 + $0x10] sm:$0xcc] %vm1906_vm7, %v943_v28  ;;  %v981_v31 = vpop.permute.xlu1 %980  ;;  %vm2252_vm6 = vmmov %vm2248_vm4 }
 0x436   :  { %948 = vst [vmem:[#allocation2 + $0x8] sm:$0xcc] %v942_v30  ;;  %v984_v32 = vrot.slane %v981_v31, 4 }
 0x438   :  { %v987_v33 = vsel %vm117_vm5, %v983_v14, %v984_v32  ;;  %v989_v29 = vsel %vm169_vm8, %v981_v31, %v984_v32  ;;  %v1707_v14 = vld [vmem:[%s2221_s5 + $0x4] sm:$0x3] }
 0x439   :  { %v988_v34 = vsel %vm169_vm8, %v979_v10, %v987_v33  ;;  %995 = vst.msk [vmem:[#allocation2 + $0x28] sm:$0x33] %vm1880_vm2, %v989_v29  ;;  %v1757_v36 = vld [vmem:[#allocation2 + $0x4] ss:$24 sps:$4 sm:$0x3f]   ;;  %vm2238_vm2 = vcmask 1039360  }
 0x43a   :  { %994 = vst [vmem:[#allocation2 + $0x20] sm:$0x33] %v988_v34  ;;  %v1759_v37 = vld [vmem:[#allocation2] ss:$24 sps:$4 sm:$0x3f]   ;;  %1031 = vrot.lane.b32.xlu1 %v1757_v36, %s1821_s19  ;;  %vm2239_vm7 = vmmov %vm2238_vm2  ;;  %vm2240_vm8 = vcmask 1045504  }
 0x43b   :  { %1029 = vrot.lane.b32.xlu0 %v1759_v37, %s1821_s19  ;;  %vm2241_vm9 = vmmov %vm2240_vm8 }
 0x43c   :  { %vm2242_vm10 = vmmov %vm2238_vm2 }
 0x43d   :  { %vm2243_vm11 = vmmov %vm2240_vm8 }
 0x43e   :  { %vm2244_vm12 = vmmov %vm2238_vm2 }
 0x43f   :  { %vm2245_vm13 = vmmov %vm2238_vm2 }
 0x440   :  { %v1763_v52 = vld [vmem:[#allocation2 + $0x14] ss:$24 sps:$4 sm:$0x3f]   ;;  %v1765_v61 = vld [vmem:[#allocation2 + $0x10] ss:$24 sps:$4 sm:$0x3f]   ;;  %vm2246_vm15 = vmmov %vm2240_vm8 }
 0x441   :  { %v1760_v21 = vld [vmem:[#allocation2 + $0xc] ss:$24 sps:$4 sm:$0x3f]   ;;  %v1762_v38 = vld [vmem:[#allocation2 + $0x8] ss:$24 sps:$4 sm:$0x3f]   ;;  %vm2247_vm1 = vmmov %vm2240_vm8 }
 0x442   :  { %1035 = vrot.lane.b32.xlu1 %v1760_v21, %s1821_s19  ;;  %1033 = vrot.lane.b32.xlu0 %v1762_v38, %s1821_s19  ;;  %vm2249_vm14 = vmmov %vm2247_vm1 }
 0x443   :  { %vm2250_vm0 = vmmov %vm2247_vm1 }
 0x444   :  { %vm2251_vm3 = vmmov %vm2250_vm0 }
 0x446   :  { %1039 = vrot.lane.b32.xlu1 %v1763_v52, %s1821_s19  ;;  %1037 = vrot.lane.b32.xlu0 %v1765_v61, %s1821_s19 }
 0x44a   :  { %1338 = vrot.lane.b32.xlu1 %v1757_v36, %s1822_s20  ;;  %1336 = vrot.lane.b32.xlu0 %v1759_v37, %s1822_s20 }
 0x44e   :  { %1342 = vrot.lane.b32.xlu1 %v1760_v21, %s1822_s20  ;;  %1340 = vrot.lane.b32.xlu0 %v1762_v38, %s1822_s20 }
 0x452   :  { %1346 = vrot.lane.b32.xlu1 %v1763_v52, %s1822_s20  ;;  %1344 = vrot.lane.b32.xlu0 %v1765_v61, %s1822_s20 }
 0x4ac   :  { %v1032_v6 = vpop.permute.xlu1 %1031 }
 0x4ad   :  { %v1030_v4 = vpop.permute.xlu0 %1029 }
 0x4ae   :  { %v1041_v20 = vsel %vm2238_vm2, %v1030_v4, %v1032_v6  ;;  %vm2253_vm2 = vmmov %vm2250_vm0 }
 0x4af   :  { %v1050_v41 = vsel %vm2240_vm8, %v1041_v20, 0  ;;  %v1194_v55 = vsel %vm2253_vm2, %v1759_v37, 0  ;;  %vm2255_vm8 = vcmask 1031168  }
 0x4b4   :  { %v1036_v27 = vpop.permute.xlu1 %1035  ;;  %v1034_v35 = vpop.permute.xlu0 %1033 }
 0x4b5   :  { %v1042_v39 = vsel %vm2239_vm7, %v1032_v6, %v1034_v35  ;;  %v1043_v42 = vsel %vm2242_vm10, %v1034_v35, %v1036_v27  ;;  %vm2254_vm7 = vmmov %vm2250_vm0 }
 0x4b6   :  { %1695 = vmatprep.subr.msk.bf16.mxu1 %vm2241_vm9, %v1042_v39  ;;  %v1056_v49 = vsel %vm2246_vm15, %v1043_v42, 0  ;;  %vm2256_vm9 = vmmov %vm2248_vm4 }
 0x4b7   :  { %1082 = vmatpush1.bf16.msra.mxu1 %v1050_v41  ;;  %vm2257_vm10 = vmmov %vm2250_vm0 }
 0x4b8   :  { %v1040_v43 = vpop.permute.xlu1 %1039  ;;  %v1038_v45 = vpop.permute.xlu0 %1037  ;;  %v1200_v58 = vsel %vm2257_vm10, %v1762_v38, 0  ;;  %vm2261_vm15 = vmmov %vm2250_vm0 }
 0x4b9   :  { %1699 = vmatprep.subr.msk.bf16.mxu1 %vm2243_vm11, %v1040_v43  ;;  %v1044_v46 = vsel %vm2244_vm12, %v1036_v27, %v1038_v45  ;;  %v1045_v48 = vsel %vm2245_vm13, %v1038_v45, %v1040_v43  ;;  %vm2258_vm11 = vmmov %vm2250_vm0  ;;  %v1206_v1 = vsel %vm2261_vm15, %v1765_v61, 0 }
 0x4ba   :  { %v1062_v50 = vsel %vm2247_vm1, %v1045_v48, 0  ;;  %1696 = vmatmul.mubr.msk.bf16.vlgmr.msra.gmra.mxu1 %vm2248_vm4, %v1688_v44  ;;  %1697 = vmatprep.subr.msk.bf16.mxu0 %vm2249_vm14, %v1044_v46  ;;  %vm2259_vm12 = vmmov %vm2255_vm8 }
 0x4bb   :  { %1123 = vmatpush1.bf16.msra.mxu0 %v1056_v49  ;;  %1164 = vmatpush1.bf16.msra.mxu1 %v1062_v50  ;;  %vm2260_vm13 = vmmov %vm2248_vm4 }
 0x4bc   :  { %v1337_v51 = vpop.permute.xlu0 %1336  ;;  %1701 = vmatprep.subr.msk.bf16.mxu0 %vm2250_vm0, %v1757_v36  ;;  %1703 = vmatprep.subr.msk.bf16.mxu1 %vm2251_vm3, %v1760_v21  ;;  %v1339_v54 = vpop.permute.xlu1 %1338  ;;  %vm2262_vm1 = vmmov %vm2255_vm8 }
 0x4bd   :  { %1181 = vmatprep.mubr.bf16.mxu1 %v1820_v40  ;;  %v1348_v2 = vsel %vm2262_vm1, %v1337_v51, %v1339_v54  ;;  %vm2263_vm4 = vmmov %vm2250_vm0 }
 0x4be   :  { %1698 = vmatmul.mubr.msk.bf16.vlgmr.msra.gmra.mxu0 %vm2252_vm6, %v1688_v44  ;;  %vm2264_vm14 = vmmov %vm2250_vm0 }
 0x4bf   :  { %1226 = vmatpush1.bf16.msra.mxu0 %v1194_v55  ;;  %1243 = vmatprep.mubr.bf16.mxu0 %v1820_v40  ;;  %v1357_v3 = vsel %vm2264_vm14, %v1348_v2, 0  ;;  %vm2265_vm0 = vmmov %vm2252_vm6 }
 0x4c0   :  { %v1341_v56 = vpop.permute.xlu0 %1340  ;;  %1705 = vmatprep.subr.msk.bf16.mxu0 %vm2254_vm7, %v1763_v52  ;;  %v1343_v60 = vpop.permute.xlu1 %1342  ;;  %vm2266_vm3 = vmmov %vm2262_vm1 }
 0x4c1   :  { %v1349_v57 = vsel %vm2255_vm8, %v1339_v54, %v1341_v56  ;;  %v1350_v8 = vsel %vm2266_vm3, %v1341_v56, %v1343_v60  ;;  %vm2267_vm6 = vmmov %vm2253_vm2 }
 0x4c2   :  { %1700 = vmatmul.mubr.msk.bf16.vlgmr.msra.gmra.mxu1 %vm2256_vm9, %v1688_v44  ;;  %v1363_v10 = vsel %vm2253_vm2, %v1350_v8, 0  ;;  %vm2268_vm7 = vmmov %vm2265_vm0 }
 0x4c3   :  { %1267 = vmatpush1.bf16.msra.mxu1 %v1200_v58  ;;  %1284 = vmatprep.mubr.bf16.mxu1 %v1820_v40  ;;  %vm2269_vm8 = vmmov %vm2262_vm1  ;;  %vm1597_vm1 = vcmask 891904  }
 0x4c4   :  { %1708 = vmatprep.subr.msk.bf16.mxu1 %vm2258_vm11, %v1349_v57  ;;  %v1345_v63 = vpop.permute.xlu0 %1344  ;;  %v1347_v9 = vpop.permute.xlu1 %1346  ;;  %vm2270_vm9 = vmmov %vm2253_vm2 }
 0x4c5   :  { %v1351_v0 = vsel %vm2259_vm12, %v1343_v60, %v1345_v63  ;;  %v1352_v13 = vsel %vm2269_vm8, %v1345_v63, %v1347_v9  ;;  %vm2271_vm10 = vmmov %vm2265_vm0 }
 0x4c6   :  { %1702 = vmatmul.mubr.msk.bf16.vlgmr.msra.gmra.mxu0 %vm2260_vm13, %v996_v59  ;;  %v1369_v15 = vsel %vm2270_vm9, %v1352_v13, 0  ;;  %vm2272_vm11 = vmmov %vm2265_vm0  ;;  %vm2274_vm13 = vcmask 60416  }
 0x4c7   :  { %1308 = vmatpush1.bf16.msra.mxu0 %v1206_v1  ;;  %1325 = vmatprep.mubr.bf16.mxu0 %v1820_v40  ;;  %vm2273_vm12 = vmmov %vm2265_vm0 }
 0x4c8   :  { %1710 = vmatprep.subr.msk.bf16.mxu0 %vm2263_vm4, %v1351_v0  ;;  %vm2275_vm15 = vmmov %vm2274_vm13  ;;  %vm1635_vm4 = vcmask 64516  }
 0x4c9   :  { %vm1636_vm14 = vmor %vm1635_vm4, %vm117_vm5 }
 0x4ca   :  { %1704 = vmatmul.mubr.msk.bf16.vlgmr.msra.gmra.mxu1 %vm2265_vm0, %v996_v59 }
 0x4cb   :  { %1389 = vmatpush1.bf16.msra.mxu1 %v1357_v3  ;;  %1406 = vmatprep.mubr.bf16.mxu1 %v1820_v40 }
 0x4cc   :  { %1712 = vmatprep.subr.msk.bf16.mxu1 %vm2267_vm6, %v1347_v9 }
 0x4ce   :  { %1706 = vmatmul.mubr.msk.bf16.vlgmr.msra.gmra.mxu0 %vm2268_vm7, %v996_v59 }
 0x4cf   :  { %1430 = vmatpush1.bf16.msra.mxu0 %v1363_v10  ;;  %1447 = vmatprep.mubr.bf16.mxu0 %v1820_v40 }
 0x4d2   :  { %1709 = vmatmul.mubr.msk.bf16.vlgmr.msra.gmra.mxu1 %vm2271_vm10, %v1707_v14 }
 0x4d3   :  { %1471 = vmatpush1.bf16.msra.mxu1 %v1369_v15  ;;  %1488 = vmatprep.mubr.bf16.mxu1 %v1820_v40 }
 0x4d6   :  { %1711 = vmatmul.mubr.msk.bf16.vlgmr.msra.gmra.mxu0 %vm2272_vm11, %v1707_v14 }
 0x4da   :  { %1713 = vmatmul.mubr.msk.bf16.vlgmr.msra.gmra.mxu1 %vm2273_vm12, %v1707_v14 }
 0x57a   :  { %v1101_v16 = vpop.f32.mrf.mxu1 }
 0x57c   :  { %v1103_v17 = vpop.f32.mrf.mxu1 }
 0x57e   :  { %v1105_v18 = vpop.f32.mrf.mxu1  ;;  %v1142_v19 = vpop.f32.mrf.mxu0 }
 0x580   :  { %v1106_v22 = vpop.f32.mrf.mxu1  ;;  %v1144_v23 = vpop.f32.mrf.mxu0 }
 0x582   :  { %v1146_v5 = vpop.f32.mrf.mxu0  ;;  %v1183_v24 = vpop.f32.mrf.mxu1 }
 0x584   :  { %v1147_v25 = vpop.f32.mrf.mxu0  ;;  %v1185_v26 = vpop.f32.mrf.mxu1 }
 0x586   :  { %v1187_v28 = vpop.f32.mrf.mxu1  ;;  %v1245_v30 = vpop.f32.mrf.mxu0 }
 0x587   :  { %v1246_v52 = vadd.f32 %v1245_v30, %v1101_v16 }
 0x588   :  { %v1188_v31 = vpop.f32.mrf.mxu1  ;;  %v1247_v32 = vpop.f32.mrf.mxu0 }
 0x589   :  { %v1248_v4 = vadd.f32 %v1247_v32, %v1103_v17 }
 0x58a   :  { %v1249_v33 = vpop.f32.mrf.mxu0  ;;  %v1286_v40 = vpop.f32.mrf.mxu1 }
 0x58b   :  { %v1287_v39 = vadd.f32 %v1286_v40, %v1142_v19 }
 0x58c   :  { %v1250_v29 = vpop.f32.mrf.mxu0  ;;  %v1288_v34 = vpop.f32.mrf.mxu1 }
 0x58d   :  { %v1289_v49 = vadd.f32 %v1288_v34, %v1144_v23 }
 0x58e   :  { %v1290_v36 = vpop.f32.mrf.mxu1  ;;  %v1327_v37 = vpop.f32.mrf.mxu0 }
 0x58f   :  { %v1328_v50 = vadd.f32 %v1327_v37, %v1183_v24 }
 0x590   :  { %v1291_v21 = vpop.f32.mrf.mxu1  ;;  %v1329_v38 = vpop.f32.mrf.mxu0 }
 0x591   :  { %v1330_v58 = vadd.f32 %v1329_v38, %v1185_v26 }
 0x592   :  { %v1331_v61 = vpop.f32.mrf.mxu0  ;;  %v1408_v6 = vpop.f32.mrf.mxu1 }
 0x593   :  { %v2151_v20 = vadd.f32 %v1408_v6, %v1246_v52 }
 0x594   :  { %v1332_v27 = vpop.f32.mrf.mxu0  ;;  %v1410_v35 = vpop.f32.mrf.mxu1 }
 0x595   :  { %v1503_v41 = vmul.f32 %v2151_v20, %v1991_v47  ;;  %v2155_v42 = vadd.f32 %v1410_v35, %v1248_v4  ;;  %v1574_v4 = vld [vmem:[%s2216_s0] sm:$0xff]  ;;  %v1575_v35 = vld [vmem:[%s2216_s0 + $0x8] sm:$0xf]  ;;  %s1824_s0 = smov 109  }
 0x596   :  { %v1412_v43 = vpop.f32.mrf.mxu1  ;;  %v1449_v44 = vpop.f32.mrf.mxu0  ;;  %v1576_v27 = vunpack.c.l.bf16 %v1574_v4 }
 0x597   :  { %v1522_v45 = vmul.f32 %v1503_v41, %v2151_v20  ;;  %v1504_v46 = vmul.f32 %v2155_v42, %v1996_v53  ;;  %v2160_v48 = vadd.f32 %v1449_v44, %v1287_v39  ;;  %v1509_v55 = vsel %vm117_vm5, %v1503_v41, 0.0  ;;  %v1545_v39 = vld [vmem:[%s2222_s6] sm:$0xf]  ;;  %s1825_s6 = smov [#allocation7]  }
 0x598   :  { %v1413_v51 = vpop.f32.mrf.mxu1  ;;  %v1451_v54 = vpop.f32.mrf.mxu0  ;;  %v1582_v41 = vcombine.high %v1576_v27, %v1576_v27  ;;  %v1578_v43 = vunpack.c.l.bf16 %v1575_v35  ;;  %v1577_v44 = vunpack.c.h.bf16 %v1574_v4 }
 0x599   :  { %v1510_v56 = vsel %vm117_vm5, %v1504_v46, 0.0  ;;  %v1523_v47 = vmul.f32 %v1504_v46, %v2155_v42  ;;  %v1505_v57 = vmul.f32 %v2160_v48, %v2005_v62  ;;  %v1528_v59 = vsel %vm117_vm5, %v1522_v45, 0.0 }
 0x59a   :  { %v1511_v60 = vadd.f32 %v1510_v56, %v1509_v55  ;;  %v2168_v53 = vadd.f32 %v1451_v54, %v1289_v49  ;;  %v1453_v63 = vpop.f32.mrf.mxu0  ;;  %v1490_v0 = vpop.f32.mrf.mxu1  ;;  %v1549_v49 = vld [vmem:[%s2223_s7] sm:$0xf]  ;;  %v1728_v51 = vpack.i.bf16 %v1582_v41, %v1576_v27  ;;  %v1584_v54 = vcombine.high %v1578_v43, %v1578_v43  ;;  %s1644_s7 = sshll.u32 %s1825_s6, 4  ;;  %s1645_s7 = int_to_ptr.vmem [resolvable:$true] %s1644_s7 }
 0x59b   :  { %v1529_v1 = vsel %vm117_vm5, %v1523_v47, 0.0  ;;  %v1512_v2 = vsel %vm117_vm5, %v1505_v57, 0.0  ;;  %v1524_v3 = vmul.f32 %v1505_v57, %v2160_v48  ;;  %v2173_v8 = vadd.f32 %v1490_v0, %v1328_v50  ;;  %s1790_s15 = scalar_lea.vmem %s1645_s7, 384  ;;  %p1795_p6 = scmp.lt.s32.totalorder %s1645_s7, %s1645_s7 }
 0x59c   :  { %v1530_v9 = vadd.f32 %v1529_v1, %v1528_v59  ;;  %v1506_v62 = vmul.f32 %v2168_v53, %v2012_v7  ;;  %v1454_v10 = vpop.f32.mrf.mxu0  ;;  %v1492_v13 = vpop.f32.mrf.mxu1  ;;  %v1513_v14 = vadd.f32 %v1512_v2, %v1511_v60  ;;  %v1583_v55 = vcombine.high %v1577_v44, %v1577_v44  ;;  %p1791_p5 = scmp.ne.s32.totalorder %s1645_s7, %s1790_s15  ;;  %p1796_p7 = scmp.lt.s32.totalorder %s1790_s15, %s1790_s15 }
 0x59d   :  { %v1531_v15 = vsel %vm117_vm5, %v1524_v3, 0.0  ;;  %v1507_v16 = vmul.f32 %v2173_v8, %v2014_v11  ;;  %v1502_v17 = vadd.f32 %v1492_v13, %v1330_v58  ;;  %v1738_v47 = vpack.i.bf16 %v1584_v54, %v1578_v43 }
 0x59e   :  { %v1525_v18 = vmul.f32 %v1506_v62, %v2168_v53  ;;  %v1494_v19 = vpop.f32.mrf.mxu1  ;;  %v1514_v22 = vsel %vm117_vm5, %v1506_v62, 0.0  ;;  %v1532_v23 = vadd.f32 %v1531_v15, %v1530_v9  ;;  %v1733_v57 = vpack.i.bf16 %v1583_v55, %v1577_v44  ;;  %p1797_p8 = por %p1796_p7, %p1795_p6 }
 0x59f   :  { %v1526_v5 = vmul.f32 %v1507_v16, %v2173_v8  ;;  %v1508_v24 = vmul.f32 %v1502_v17, %v2016_v12  ;;  %v1515_v7 = vadd.f32 %v1514_v22, %v1513_v14  ;;  %v1516_v25 = vsel %vm117_vm5, %v1507_v16, 0.0 }
 0x5a0   :  { %v1495_v26 = vpop.f32.mrf.mxu1  ;;  %v1533_v28 = vsel %vm117_vm5, %v1525_v18, 0.0  ;;  %p1798_p9 = pnand %p1797_p8, %p1791_p5 }
 0x5a1   :  { %v1517_v30 = vadd.f32 %v1516_v25, %v1515_v7  ;;  %v1518_v11 = vsel %vm2274_vm13, %v1508_v24, 0.0  ;;  %v1527_v31 = vmul.f32 %v1508_v24, %v1502_v17  ;;  %v1534_v32 = vadd.f32 %v1533_v28, %v1532_v23 }
 0x5a2   :  { %v1535_v33 = vsel %vm117_vm5, %v1526_v5, 0.0 }
 0x5a3   :  { %v1519_v40 = vadd.f32 %v1518_v11, %v1517_v30  ;;  %v1536_v29 = vadd.f32 %v1535_v33, %v1534_v32  ;;  %v1537_v34 = vsel %vm2275_vm15, %v1527_v31, 0.0 }
 0x5a5   :  { %1520 = vadd.xlane.f32.xlu0 %v1519_v40  ;;  %v1538_v36 = vadd.f32 %v1537_v34, %v1536_v29 }
 0x5a7   :  { %1539 = vadd.xlane.f32.xlu1 %v1538_v36 }
 0x62e   :  { %v1521_v12 = vpop.xlane.xlu0 %1520 }
 0x62f   :  { %v1541_v37 = vmul.f32 0.001953125, %v1521_v12 }
 0x630   :  { %v1540_v21 = vpop.xlane.xlu1 %1539 }
 0x631   :  { %v1543_v38 = vmul.f32 %v1541_v37, %v1541_v37  ;;  %v1542_v52 = vmul.f32 0.001953125, %v1540_v21 }
 0x633   :  { %v1544_v61 = vsub.f32 %v1542_v52, %v1543_v38 }
 0x635   :  { %v1546_v6 = vadd.f32 1e-05, %v1544_v61 }
 0x637   :  { %1768 = vrsqrt.f32 %v1546_v6 }
 0x644   :  { %v1769_v45 = vpop.eup %1768 }
 0x645   :  { %v1548_v46 = vmul.f32 %v1769_v45, %v1545_v39 }
 0x647   :  { %1554 = vperm.xlu0 %1726, %v1548_v46   ;;  %v1550_v50 = vmul.f32 %v1548_v46, %v1541_v37 }
 0x649   :  { %v1551_v56 = vsub.f32 %v1549_v49, %v1550_v50 }
 0x64b   :  { %1565 = vperm.xlu1 %1727, %v1551_v56   ;;  %1729 = vrot.lane.b32.xlu0 %v1728_v51, %s1824_s0 }
 0x64f   :  { %1739 = vrot.lane.b32.xlu0 %v1738_v47, %s1824_s0  ;;  %1734 = vrot.lane.b32.xlu1 %v1733_v57, %s1824_s0 }
 0x6c2   :  { %v1555_v58 = vpop.permute.xlu0 %1554 }
 0x6c3   :  { %v1557_v59 = vmul.f32 %v1555_v58, %v2151_v20  ;;  %v1561_v3 = vmul.f32 %v1555_v58, %v2173_v8  ;;  %v1562_v9 = vmul.f32 %v1555_v58, %v1502_v17  ;;  %v1558_v10 = vmul.f32 %v1555_v58, %v2155_v42 }
 0x6c4   :  { %v1559_v16 = vmul.f32 %v1555_v58, %v2160_v48  ;;  %v1560_v20 = vmul.f32 %v1555_v58, %v2168_v53 }
 0x6c6   :  { %v1730_v60 = vpop.permute.xlu0 %1729  ;;  %v1566_v63 = vpop.permute.xlu1 %1565 }
 0x6c7   :  { %v1732_v0 = vunpack.i.h.bf16 %v1730_v60  ;;  %v1731_v1 = vunpack.i.l.bf16 %v1730_v60  ;;  %v1568_v2 = vadd.f32 %v1566_v63, %v1557_v59  ;;  %v1572_v14 = vadd.f32 %v1566_v63, %v1561_v3 }
 0x6c8   :  { %v1573_v15 = vadd.f32 %v1566_v63, %v1562_v9  ;;  %v1569_v24 = vadd.f32 %v1566_v63, %v1558_v10  ;;  %v1570_v8 = vadd.f32 %v1566_v63, %v1559_v16  ;;  %v1571_v17 = vadd.f32 %v1566_v63, %v1560_v20 }
 0x6c9   :  { %v1598_v62 = vsel %vm1597_vm1, %v1731_v1, %v1732_v0 }
 0x6ca   :  { %v1740_v13 = vpop.permute.xlu0 %1739  ;;  %v1735_v18 = vpop.permute.xlu1 %1734  ;;  %v1609_v7 = vadd.f32 %v1598_v62, %v1568_v2 }
 0x6cb   :  { %v1742_v19 = vunpack.i.h.bf16 %v1740_v13  ;;  %v1741_v22 = vunpack.i.l.bf16 %v1740_v13  ;;  %v1737_v23 = vunpack.i.h.bf16 %v1735_v18  ;;  %v1736_v5 = vunpack.i.l.bf16 %v1735_v18 }
 0x6cc   :  { %v1615_v34 = vmax.f32 %v1609_v7, 0.0 }
 0x6cd   :  { %v1602_v25 = vsel %vm1597_vm1, %v1741_v22, %v1742_v19  ;;  %v1614_v42 = vadd.f32 %v1742_v19, %v1573_v15  ;;  %v1601_v26 = vsel %vm1597_vm1, %v1737_v23, %v1741_v22  ;;  %v1599_v28 = vsel %vm1597_vm1, %v1732_v0, %v1736_v5 }
 0x6ce   :  { %v1613_v30 = vadd.f32 %v1602_v25, %v1572_v14  ;;  %v1612_v48 = vadd.f32 %v1601_v26, %v1571_v17  ;;  %v1600_v53 = vsel %vm1597_vm1, %v1736_v5, %v1737_v23  ;;  %v1610_v11 = vadd.f32 %v1599_v28, %v1569_v24 }
 0x6cf   :  { %v1620_v31 = vmax.f32 %v1614_v42, 0.0  ;;  %v1611_v32 = vadd.f32 %v1600_v53, %v1570_v8 }
 0x6d0   :  { %v1619_v33 = vmax.f32 %v1613_v30, 0.0  ;;  %v1618_v40 = vmax.f32 %v1612_v48, 0.0  ;;  %v1616_v29 = vmax.f32 %v1610_v11, 0.0 }
 0x6d1   :  { %v1617_v36 = vmax.f32 %v1611_v32, 0.0 }
 0x6d2   :  { %v1629_v12 = vcombine.low %v1619_v33, %v1620_v31  ;;  %v1627_v37 = vcombine.low %v1615_v34, %v1616_v29 }
 0x6d3   :  { %v1628_v21 = vcombine.low %v1617_v36, %v1618_v40 }
 0x6d4   :  { %1633 = vst [vmem:[#allocation7] sm:$0xff] %v1627_v37  ;;  %1637 = vst.msk [vmem:[#allocation7 + $0x10] sm:$0xff] %vm1636_vm14, %v1629_v12 }
 0x6d5   :  { %1634 = vst [vmem:[#allocation7 + $0x8] sm:$0xff] %v1628_v21 }
 0x6d6   :  { %1801 = shalt.err (!%p1798_p9)
}
 0x6d7   :  { %1647 = dma.vmem_to_hbm [thread:$0]  %s1645_s7, 384, %s2224_s8, [#allocation6]  }
 0x6d8   :  { %1812 = dma.done.wait [#allocation6], 384  }
 0x6d9   :  { %1813 = vsyncadd [#allocation6], 4294966912 }
 0x6da   :  { %1651 = vsyncpa [#allocation5], 1 }
 0x6db   :  { %1652 = vsyncpa [#allocation6], 1 }

</bundles_post_ra>
